<compile_context>
chip_gen: v5e
topology: v5e:2x2
jax: 0.10.0
libtpu: 0.0.40
codegen_flags: <defaults>
</compile_context>

<pallas_src>
import math

import jax
import jax.numpy as jnp
from jax.experimental import pallas as pl
from jax.experimental.pallas import tpu as pltpu

_PALLAS_MIN_BYTES = 1 * 1024 * 1024   # below this a fused XLA add wins (dispatch-bound)
_MIN_GRID_STEPS = 4                   # expose >= 4 seq tiles when S allows (v7x: 2 TCs)


def make_pe_buffer(d_model: int, max_len: int = 5000, dtype=jnp.float32) -> jnp.ndarray:
    """Buffer setup identical to the module __init__ (sin+cos, arange step 1).

    Built directly in the target dtype so forward never re-converts it in HBM.
    """
    position = jnp.arange(0, max_len, dtype=jnp.float32)[:, None]            # (L, 1)
    div_term = jnp.exp(
        jnp.arange(0, d_model, dtype=jnp.float32) * (-math.log(10000.0) / d_model)
    )                                                                         # (D,)
    arg = position * div_term                                                 # (L, D)
    pe = jnp.sin(arg) + jnp.cos(arg)
    return pe.astype(dtype)


def _pos_enc_kernel(x_ref, pe_ref, o_ref):
    # x_ref : (t_s, B*D)  lane-dense tile of x.reshape(S, B*D)
    # pe_ref: (t_s, D)    matching rows of pe[pos:pos+S]
    # o_ref : (t_s, B*D)
    pe_t = pe_ref[...]
    n_batch = x_ref.shape[1] // pe_t.shape[1]
    if n_batch > 1:
        # Replicate pe across the batch axis of the flattened (B*D) lane dim.
        # Lane-dim concatenate is VPU/XLU work, fully hidden behind the
        # HBM-bound x/out DMA; the store below is one full-width (t_s, B*D) vst.
        pe_t = jnp.concatenate([pe_t] * n_batch, axis=1)
    o_ref[...] = x_ref[...] + pe_t


def _round_up(a: int, m: int) -> int:
    return ((a + m - 1) // m) * m


def _vmem_budget():
    """(scoped-VMEM limit, x-tile byte target), generation-aware."""
    try:
        cap = int(pltpu.get_tpu_info().vmem_capacity_bytes)
    except Exception:
        cap = 64 << 20                            # conservative default (v7x size)
    limit = min((cap * 3) // 4, 100 << 20)        # ~96 MiB v5e/v6e, ~48 MiB v7x
    tile_target = max(2 << 20, limit // 16)       # ~6 MiB v5e/v6e, ~3 MiB v7x
    return limit, tile_target


def _choose_seq_tile(seq_len: int, row_bytes: int, q: int, tile_target: int) -> int:
    """Rows per seq tile: a multiple of the sublane quantum q, ~tile_target bytes,
    shrunk so ~_MIN_GRID_STEPS grid steps exist whenever seq_len allows."""
    rows_from_bytes = max(q, (tile_target // max(row_bytes, 1)) // q * q)
    rows_for_steps = _round_up(pl.cdiv(seq_len, _MIN_GRID_STEPS), q)
    t = max(q, min(rows_from_bytes, rows_for_steps))
    return min(t, _round_up(seq_len, q))


def positional_encoding_forward(x: jnp.ndarray, pe: jnp.ndarray, pos=0, *,
                                force_pallas: bool = False) -> jnp.ndarray:
    """x: (S, B, D); pe: (max_len, D) from make_pe_buffer; returns x + pe[pos:pos+S]."""
    S, B, D = x.shape
    max_len, d_model = pe.shape
    assert d_model == D, "pe buffer d_model mismatch"
    if isinstance(pos, int) and (pos < 0 or pos + S > max_len):
        raise ValueError(f"pos + seq_len ({pos} + {S}) exceeds pe max_len ({max_len})")
    if pe.dtype != x.dtype:
        pe = pe.astype(x.dtype)  # defensive; build pe with make_pe_buffer(dtype=x.dtype)

    # Compact per-call pe operand: exactly the S rows used, aligned to tile row 0.
    # Costs one extra S*D HBM pass (<= 1/B of total traffic) and removes both the
    # VMEM-resident full pe buffer and any in-kernel unaligned dynamic slicing.
    pe_call = jax.lax.dynamic_slice_in_dim(pe, jnp.asarray(pos, jnp.int32), S, axis=0)

    # Tiny inputs: a fused XLA add beats kernel dispatch + DMA-setup overhead.
    if not force_pallas and x.size * x.dtype.itemsize < _PALLAS_MIN_BYTES:
        return x + pe_call[:, None, :]

    itemsize = x.dtype.itemsize
    q = max(8, 32 // itemsize)         # sublane quantum: 8 f32 / 16 bf16 / 32 int8
    vmem_cap, tile_target = _vmem_budget()
    t_s = _choose_seq_tile(S, B * D * itemsize, q, tile_target)
    num_tiles = pl.cdiv(S, t_s)

    x2 = x.reshape(S, B * D)           # free row-major view -> lane-dense last axis

    # VMEM: double-buffered x/out tiles + double-buffered pe tile + headroom,
    # clamped to the generation-aware scoped-VMEM allowance.
    x_tile_b = t_s * _round_up(B * D, 128) * itemsize
    pe_tile_b = t_s * _round_up(D, 128) * itemsize
    vmem_needed = 2 * (2 * x_tile_b + pe_tile_b) + (4 << 20)
    vmem_limit = int(min(vmem_cap, max(32 << 20, vmem_needed)))

    out2 = pl.pallas_call(
        _pos_enc_kernel,
        out_shape=jax.ShapeDtypeStruct((S, B * D), x.dtype),
        grid=(num_tiles,),
        in_specs=[
            pl.BlockSpec((t_s, B * D), lambda i: (i, 0)),   # x: tiled over seq
            pl.BlockSpec((t_s, D), lambda i: (i, 0)),       # pe: same seq tiling
        ],
        out_specs=pl.BlockSpec((t_s, B * D), lambda i: (i, 0)),
        compiler_params=pltpu.CompilerParams(
            dimension_semantics=("parallel",),   # v7x: shard seq tiles over both TCs
            vmem_limit_bytes=vmem_limit,
        ),
    )(x2, pe_call)

    # nn.Dropout in eval mode is the identity.
    # TODO(synk): train-mode dropout via in-kernel pltpu.prng_random_bits mask.
    return out2.reshape(S, B, D)


if __name__ == "__main__":
    key = jax.random.PRNGKey(0)
    ok = True

    # Case 1: module-consistent small shape (seq=8, batch=2, d_model=32).
    S, B, D = 8, 2, 32
    pe = make_pe_buffer(d_model=D, max_len=5000, dtype=jnp.float32)
    x = jax.random.normal(key, (S, B, D), dtype=jnp.float32)
    for pos in (0, 5):
        out = positional_encoding_forward(x, pe, pos=pos, force_pallas=True)
        out = jax.block_until_ready(out)
        ok = ok and (out.shape == (S, B, D))
        ref = x + jax.lax.dynamic_slice_in_dim(pe, pos, S, axis=0)[:, None, :]
        ok = ok and bool(jnp.allclose(out, ref, atol=1e-6, rtol=1e-6))

    # Case 2: multi-tile grid (4 seq tiles) with d_model a multiple of 128.
    S2, B2, D2 = 64, 4, 128
    pe2 = make_pe_buffer(d_model=D2, max_len=512, dtype=jnp.float32)
    x2 = jax.random.normal(jax.random.fold_in(key, 1), (S2, B2, D2), dtype=jnp.float32)
    out2 = positional_encoding_forward(x2, pe2, pos=7, force_pallas=True)
    out2 = jax.block_until_ready(out2)
    ok = ok and (out2.shape == (S2, B2, D2))
    ref2 = x2 + jax.lax.dynamic_slice_in_dim(pe2, 7, S2, axis=0)[:, None, :]
    ok = ok and bool(jnp.allclose(out2, ref2, atol=1e-6, rtol=1e-6))

    assert ok
    print("KERNEL_OK")
</pallas_src>

<mosaic_0001>
module attributes {stable_mosaic.version = 11 : i64} {
  func.func @_pos_enc_kernel(%arg0: i32, %arg1: memref<8x64xf32, #tpu.memory_space<vmem>>, %arg2: memref<8x32xf32, #tpu.memory_space<vmem>>, %arg3: memref<8x64xf32, #tpu.memory_space<vmem>>) attributes {dimension_semantics = [#tpu.dimension_semantics<parallel>], iteration_bounds = array<i64: 1>, scalar_prefetch = 0 : i64, scratch_operands = 0 : i64, tpu.core_type = #tpu.core_type<tc>, window_params = [{transform_indices = @transform_0, window_bounds = array<i64: 8, 64>}, {transform_indices = @transform_1, window_bounds = array<i64: 8, 32>}, {transform_indices = @transform_2, window_bounds = array<i64: 8, 64>}]} {
    %c0 = arith.constant 0 : index
    %c0_0 = arith.constant 0 : index
    %0 = vector.load %arg2[%c0, %c0_0] : memref<8x32xf32, #tpu.memory_space<vmem>>, vector<8x32xf32>
    %1 = tpu.concatenate %0, %0 in 1 : vector<8x32xf32>, vector<8x32xf32> -> vector<8x64xf32>
    %c0_1 = arith.constant 0 : index
    %c0_2 = arith.constant 0 : index
    %2 = vector.load %arg1[%c0_1, %c0_2] : memref<8x64xf32, #tpu.memory_space<vmem>>, vector<8x64xf32>
    %3 = arith.addf %2, %1 : vector<8x64xf32>
    %c0_3 = arith.constant 0 : index
    %c0_4 = arith.constant 0 : index
    %4 = vector.load %arg3[%c0_3, %c0_4] : memref<8x64xf32, #tpu.memory_space<vmem>>, vector<8x64xf32>
    tpu.vector_store %arg3[%c0_3, %c0_4], %3 {strides = array<i32>} : memref<8x64xf32, #tpu.memory_space<vmem>>, vector<8x64xf32>,
    return
  }
  func.func @transform_0(%arg0: i32) -> (i32, i32) {
    %c0_i32 = arith.constant 0 : i32
    %c0_i32_0 = arith.constant 0 : i32
    return %arg0, %c0_i32 : i32, i32
  }
  func.func @transform_1(%arg0: i32) -> (i32, i32) {
    %c0_i32 = arith.constant 0 : i32
    %c0_i32_0 = arith.constant 0 : i32
    return %arg0, %c0_i32 : i32, i32
  }
  func.func @transform_2(%arg0: i32) -> (i32, i32) {
    %c0_i32 = arith.constant 0 : i32
    %c0_i32_0 = arith.constant 0 : i32
    return %arg0, %c0_i32 : i32, i32
  }
}

</mosaic_0001>

<bundles_post_ra>
// kernel: tpu_custom_call.1
= control target key start
LH: loop header
LB: loop body
LE: loop exit
PB: predicated region body
PF: predicated region fallthrough
CT: control target
= control target key end

     0   :  { %7 = vsyncpa [#allocation3], 0  ;;  %s179_s0 = inlined_call_operand.hbm [shape: f32[8,64], index: 0, kind: input, shape index: {}]   ;;  %s180_s1 = inlined_call_operand.hbm [shape: f32[8,32], index: 1, kind: input, shape index: {}]   ;;  %s181_s2 = inlined_call_operand.hbm [shape: f32[8,64], index: 2, kind: output, shape index: {}]  }
   0x1   :  { %8 = vsyncpa [#allocation6], 0 }
   0x2   :  { %9 = vsyncpa [#allocation4], 0  ;;  %s15_s11 = sshll.u32 %s179_s0, 4  ;;  %s151_s12 = smov [#allocation2]   ;;  %s16_s11 = int_to_ptr.hbm [resolvable:$true] %s15_s11 }
   0x3   :  { %s17_s13 = sshll.u32 %s151_s12, 4  ;;  %s26_s16 = sshll.u32 %s180_s1, 4  ;;  %s18_s13 = int_to_ptr.vmem [resolvable:$true] %s17_s13  ;;  %s27_s16 = int_to_ptr.hbm [resolvable:$true] %s26_s16 }
   0x4   :  { %20 = dma.hbm_to_vmem [thread:$0]  %s16_s11, 128, %s18_s13, [#allocation3]  }
   0x5   :  { %s152_s17 = smov [#allocation5]  }
   0x6   :  { %s28_s18 = sshll.u32 %s152_s17, 4  ;;  %s29_s18 = int_to_ptr.vmem [resolvable:$true] %s28_s18 }
   0x7   :  { %31 = dma.hbm_to_vmem [thread:$0]  %s27_s16, 128, %s29_s18, [#allocation6]  }
   0x8   :  { %145 = dma.done.wait [#allocation3], 128  }
   0x9   :  { %146 = vsyncadd [#allocation3], 4294967168 }
   0xa   :  { %147 = dma.done.wait [#allocation6], 128  }
   0xb   :  { %148 = vsyncadd [#allocation6], 4294967168  ;;  %v40_v0 = vld [vmem:[#allocation5] sm:$0xff]  ;;  %s153_s0 = smov 32   ;;  %vm45_vm0 = vcmask 261120   ;;  %v47_v1 = vld [vmem:[#allocation2] sm:$0xff] }
   0xc   :  { %42 = vrot.lane.b32.xlu0 %v40_v0, %s153_s0  ;;  %s154_s19 = smov [#allocation7]   ;;  %s58_s1 = sshll.u32 %s181_s2, 4  ;;  %vm49_vm1 = vcmask 523264   ;;  %s59_s1 = int_to_ptr.hbm [resolvable:$true] %s58_s1 }
   0xd   :  { %s56_s20 = sshll.u32 %s154_s19, 4  ;;  %s57_s20 = int_to_ptr.vmem [resolvable:$true] %s56_s20 }
  0x7e   :  { %v43_v2 = vpop.permute.xlu0 %42 }
  0x7f   :  { %v46_v3 = vsel %vm45_vm0, %v40_v0, %v43_v2 }
  0x80   :  { %v48_v4 = vadd.f32 %v47_v1, %v46_v3 }
  0x82   :  { %50 = vst.msk [vmem:[#allocation7] sm:$0xff] %vm49_vm1, %v48_v4 }
  0x83   :  { %61 = dma.vmem_to_hbm [thread:$0]  %s57_s20, 128, %s59_s1, [#allocation4]  }
  0x84   :  { %149 = dma.done.wait [#allocation4], 128  }
  0x85   :  { %150 = vsyncadd [#allocation4], 4294967168 }
  0x86   :  { %66 = vsyncpa [#allocation3], 1 }
  0x87   :  { %67 = vsyncpa [#allocation6], 1 }
  0x88   :  { %68 = vsyncpa [#allocation4], 1 }

</bundles_post_ra>
